<compile_context>
chip_gen: v7x
topology: tpu7x:2x2x1
jax: 0.10.0
libtpu: 0.0.40
codegen_flags: <defaults>
</compile_context>

<pallas_src>
import functools

import jax
import jax.numpy as jnp
from jax import lax
from jax.experimental import pallas as pl
from jax.experimental.pallas import tpu as pltpu


def _round_up(x, m):
    return (x + m - 1) // m * m


def actor_kernel(x_ref, w1_ref, b1_ref, w2_ref, b2_ref, logitsT_ref, probsT_ref):
    # Streamed f32 states tile, cast to bf16 in-kernel (no wrapper cast pass).
    x = x_ref[...].astype(jnp.bfloat16)                            # [TB, obs]
    # Hidden layer in the transposed (lane-dense) layout:
    #   hT = W1 @ x^T  via NT dot_general (contract obs dims) -> [hid_pad, TB]
    hT = lax.dot_general(
        w1_ref[...], x,
        dimension_numbers=(((1,), (1,)), ((), ())),
        preferred_element_type=jnp.float32)
    # Bias-add + ReLU in f32, then single cast to bf16 for the second matmul.
    hT = jnp.maximum(hT + b1_ref[...], 0.0).astype(jnp.bfloat16)
    # Output layer: logitsT = W2 @ hT + b2 -> [act, TB]
    logitsT = jnp.dot(w2_ref[...], hT,
                      preferred_element_type=jnp.float32) + b2_ref[...]
    logitsT_ref[...] = logitsT
    # Numerically-stable softmax over the action axis (axis 0 here), f32,
    # exact normalization (EUP/VPU have plenty of slack at this width).
    m = jnp.max(logitsT, axis=0, keepdims=True)
    e = jnp.exp(logitsT - m)
    denom = jnp.sum(e, axis=0, keepdims=True)
    probsT_ref[...] = e / denom


def prepare_actor_params(w1, b1, w2, b2):
    """One-time (per parameter update) weight prep: bf16 cast + zero-pad hidden
    dim to a multiple of 128.  Numerically exact: padded rows get zero weight +
    zero bias -> ReLU(0)=0 -> multiplied by zero W2 columns."""
    hid, obs = w1.shape
    act = w2.shape[0]
    hid_pad = _round_up(hid, 128)
    w1b = jnp.zeros((hid_pad, obs), jnp.bfloat16).at[:hid, :].set(
        w1.astype(jnp.bfloat16))
    b1c = jnp.zeros((hid_pad, 1), jnp.float32).at[:hid, 0].set(
        b1.astype(jnp.float32))
    w2b = jnp.zeros((act, hid_pad), jnp.bfloat16).at[:, :hid].set(
        w2.astype(jnp.bfloat16))
    b2c = b2.reshape(act, 1).astype(jnp.float32)
    return w1b, b1c, w2b, b2c


@functools.partial(jax.jit, static_argnames=("block_b",))
def actor_forward(states, w1b, b1c, w2b, b2c, *, block_b=2048):
    """Forward pass of `Actor`.

    states: [B, obs_dim] f32
    w1b/b1c/w2b/b2c: outputs of prepare_actor_params (torch Linear layout).
    Returns (probs, logits), each [B, n_actions] f32; `probs` parameterizes the
    Categorical distribution the PyTorch module returns.
    """
    B, obs = states.shape
    hid_pad = w1b.shape[0]
    act = w2b.shape[0]

    # Batch tile rides the 128-wide lane axis -> lane-dense stores.
    TB = _round_up(min(block_b, B), 128)
    # v7x: guarantee >= 2 grid steps so both TensorCores get work.
    if B > 128:
        TB = min(TB, _round_up(pl.cdiv(B, 2), 128))
    TB = max(TB, 128)
    B_pad = _round_up(B, TB)

    x = states
    if B_pad != B:
        x = jnp.pad(x, ((0, B_pad - B), (0, 0)))

    grid = (B_pad // TB,)
    logitsT, probsT = pl.pallas_call(
        actor_kernel,
        out_shape=(
            jax.ShapeDtypeStruct((act, B_pad), jnp.float32),       # logits^T
            jax.ShapeDtypeStruct((act, B_pad), jnp.float32),       # probs^T
        ),
        grid=grid,
        in_specs=[
            pl.BlockSpec((TB, obs), lambda i: (i, 0)),             # streamed states (f32)
            pl.BlockSpec((hid_pad, obs), lambda i: (0, 0)),        # resident W1
            pl.BlockSpec((hid_pad, 1), lambda i: (0, 0)),          # resident b1
            pl.BlockSpec((act, hid_pad), lambda i: (0, 0)),        # resident W2
            pl.BlockSpec((act, 1), lambda i: (0, 0)),              # resident b2
        ],
        out_specs=(
            pl.BlockSpec((act, TB), lambda i: (0, i)),             # lane-dense stores
            pl.BlockSpec((act, TB), lambda i: (0, i)),
        ),
        compiler_params=pltpu.CompilerParams(
            dimension_semantics=("parallel",),                     # v7x: 2 TCs
        ),
    )(x, w1b, b1c, w2b, b2c)

    # Slice before transposing; under jit the transpose fuses into consumers.
    # (Consumers that accept the [act, B] layout can use logitsT/probsT as-is.)
    logits = logitsT[:, :B].T
    probs = probsT[:, :B].T
    return probs, logits


def reference_forward(states, w1, b1, w2, b2):
    # Same bf16-matmul / f32-accumulate precision pattern as the kernel.
    x = states.astype(jnp.bfloat16)
    h = jnp.dot(x, w1.astype(jnp.bfloat16).T,
                preferred_element_type=jnp.float32) + b1
    h = jnp.maximum(h, 0.0)
    logits = jnp.dot(h.astype(jnp.bfloat16), w2.astype(jnp.bfloat16).T,
                     preferred_element_type=jnp.float32) + b2
    probs = jax.nn.softmax(logits, axis=-1)
    return probs, logits


if __name__ == "__main__":
    # Deterministic setup: batch=256, obs_dim=32, hidden=64, n_actions=16.
    # With B=256 the v7x two-step rule gives TB=128 -> grid=(2,), so the batch
    # pipeline (and megacore split) is actually exercised.
    B, OBS, HID, ACT = 256, 32, 64, 16

    key = jax.random.PRNGKey(0)
    k_s, k_w1, k_b1, k_w2, k_b2 = jax.random.split(key, 5)

    states = jax.random.normal(k_s, (B, OBS), dtype=jnp.float32)
    # torch nn.Linear layout: weight [out, in], bias [out]
    w1 = jax.random.normal(k_w1, (HID, OBS), dtype=jnp.float32) * 0.1
    b1 = jax.random.normal(k_b1, (HID,), dtype=jnp.float32) * 0.1
    w2 = jax.random.normal(k_w2, (ACT, HID), dtype=jnp.float32) * 0.1
    b2 = jax.random.normal(k_b2, (ACT,), dtype=jnp.float32) * 0.1

    # Weight prep once (per parameter update), forward jitted.
    w1b, b1c, w2b, b2c = jax.block_until_ready(
        prepare_actor_params(w1, b1, w2, b2))

    probs, logits = jax.block_until_ready(
        actor_forward(states, w1b, b1c, w2b, b2c))

    probs_ref, logits_ref = reference_forward(states, w1, b1, w2, b2)
    assert probs.shape == (B, ACT) and logits.shape == (B, ACT)
    assert jnp.allclose(logits, logits_ref, atol=2e-3, rtol=2e-3)
    assert jnp.allclose(probs, probs_ref, atol=2e-3, rtol=2e-3)
    # Exact softmax normalization -> rows sum to 1 to f32 precision.
    assert jnp.allclose(jnp.sum(probs, axis=-1), 1.0, atol=1e-4)

    # TODO(synk): Categorical.sample()/log_prob (get_log_prob) need host-side
    # RNG sampling; the distribution is returned here as its probability table.
    print("KERNEL_OK")
</pallas_src>

<mosaic_0001>
module attributes {stable_mosaic.version = 11 : i64} {
  func.func @actor_kernel(%arg0: i32, %arg1: memref<128x32xf32, #tpu.memory_space<vmem>>, %arg2: memref<128x32xbf16, #tpu.memory_space<vmem>>, %arg3: memref<128x1xf32, #tpu.memory_space<vmem>>, %arg4: memref<16x128xbf16, #tpu.memory_space<vmem>>, %arg5: memref<16x1xf32, #tpu.memory_space<vmem>>, %arg6: memref<16x128xf32, #tpu.memory_space<vmem>>, %arg7: memref<16x128xf32, #tpu.memory_space<vmem>>) attributes {dimension_semantics = [#tpu.dimension_semantics<parallel>], iteration_bounds = array<i64: 2>, scalar_prefetch = 0 : i64, scratch_operands = 0 : i64, tpu.core_type = #tpu.core_type<tc>, window_params = [{transform_indices = @transform_0, window_bounds = array<i64: 128, 32>}, {pipeline_mode = #tpu.pipeline_mode<synchronous>, transform_indices = @transform_1, window_bounds = array<i64: 128, 32>}, {pipeline_mode = #tpu.pipeline_mode<synchronous>, transform_indices = @transform_2, window_bounds = array<i64: 128, 1>}, {pipeline_mode = #tpu.pipeline_mode<synchronous>, transform_indices = @transform_3, window_bounds = array<i64: 16, 128>}, {pipeline_mode = #tpu.pipeline_mode<synchronous>, transform_indices = @transform_4, window_bounds = array<i64: 16, 1>}, {transform_indices = @transform_5, window_bounds = array<i64: 16, 128>}, {transform_indices = @transform_6, window_bounds = array<i64: 16, 128>}]} {
    %c0 = arith.constant 0 : index
    %c0_0 = arith.constant 0 : index
    %0 = vector.load %arg1[%c0, %c0_0] : memref<128x32xf32, #tpu.memory_space<vmem>>, vector<128x32xf32>
    %1 = arith.truncf %0 : vector<128x32xf32> to vector<128x32xbf16>
    %c0_1 = arith.constant 0 : index
    %c0_2 = arith.constant 0 : index
    %2 = vector.load %arg2[%c0_1, %c0_2] : memref<128x32xbf16, #tpu.memory_space<vmem>>, vector<128x32xbf16>
    %cst = arith.constant dense<0.000000e+00> : vector<128x128xf32>
    %3 = tpu.matmul %2, %1, %cst {dimension_numbers = #tpu.dot_dimension_numbers<[1], [1], [0], [0], [0, 0, 1, 0], [], []>} : vector<128x32xbf16>, vector<128x32xbf16>, vector<128x128xf32> -> vector<128x128xf32>
    %c0_3 = arith.constant 0 : index
    %c0_4 = arith.constant 0 : index
    %4 = vector.load %arg3[%c0_3, %c0_4] : memref<128x1xf32, #tpu.memory_space<vmem>>, vector<128x1xf32>
    %5 = vector.broadcast %4 : vector<128x1xf32> to vector<128x128xf32>
    %6 = arith.addf %3, %5 : vector<128x128xf32>
    %cst_5 = arith.constant 0.000000e+00 : f32
    %7 = vector.broadcast %cst_5 : f32 to vector<128x128xf32>
    %8 = arith.maximumf %6, %7 : vector<128x128xf32>
    %9 = arith.truncf %8 : vector<128x128xf32> to vector<128x128xbf16>
    %c0_6 = arith.constant 0 : index
    %c0_7 = arith.constant 0 : index
    %10 = vector.load %arg4[%c0_6, %c0_7] : memref<16x128xbf16, #tpu.memory_space<vmem>>, vector<16x128xbf16>
    %cst_8 = arith.constant dense<0.000000e+00> : vector<16x128xf32>
    %11 = tpu.matmul %10, %9, %cst_8 {dimension_numbers = #tpu.dot_dimension_numbers<[1], [0], [0], [1], [0, 0, 1, 1], [], []>} : vector<16x128xbf16>, vector<128x128xbf16>, vector<16x128xf32> -> vector<16x128xf32>
    %c0_9 = arith.constant 0 : index
    %c0_10 = arith.constant 0 : index
    %12 = vector.load %arg5[%c0_9, %c0_10] : memref<16x1xf32, #tpu.memory_space<vmem>>, vector<16x1xf32>
    %13 = vector.broadcast %12 : vector<16x1xf32> to vector<16x128xf32>
    %14 = arith.addf %11, %13 : vector<16x128xf32>
    %c0_11 = arith.constant 0 : index
    %c0_12 = arith.constant 0 : index
    %15 = vector.load %arg6[%c0_11, %c0_12] : memref<16x128xf32, #tpu.memory_space<vmem>>, vector<16x128xf32>
    tpu.vector_store %arg6[%c0_11, %c0_12], %14 {strides = array<i32>} : memref<16x128xf32, #tpu.memory_space<vmem>>, vector<16x128xf32>,
    %cst_13 = arith.constant dense<0xFF800000> : vector<128xf32>
    %16 = vector.multi_reduction <maximumf>, %14, %cst_13 [0] : vector<16x128xf32> to vector<128xf32>
    %17 = vector.shape_cast %16 : vector<128xf32> to vector<1x128xf32>
    %18 = vector.broadcast %17 : vector<1x128xf32> to vector<16x128xf32>
    %19 = arith.subf %14, %18 : vector<16x128xf32>
    %20 = math.exp %19 : vector<16x128xf32>
    %cst_14 = arith.constant dense<0.000000e+00> : vector<128xf32>
    %21 = vector.multi_reduction <add>, %20, %cst_14 [0] : vector<16x128xf32> to vector<128xf32>
    %22 = vector.shape_cast %21 : vector<128xf32> to vector<1x128xf32>
    %23 = vector.broadcast %22 : vector<1x128xf32> to vector<16x128xf32>
    %24 = arith.divf %20, %23 : vector<16x128xf32>
    %c0_15 = arith.constant 0 : index
    %c0_16 = arith.constant 0 : index
    %25 = vector.load %arg7[%c0_15, %c0_16] : memref<16x128xf32, #tpu.memory_space<vmem>>, vector<16x128xf32>
    tpu.vector_store %arg7[%c0_15, %c0_16], %24 {strides = array<i32>} : memref<16x128xf32, #tpu.memory_space<vmem>>, vector<16x128xf32>,
    return
  }
  func.func @transform_0(%arg0: i32) -> (i32, i32) {
    %c0_i32 = arith.constant 0 : i32
    %c0_i32_0 = arith.constant 0 : i32
    return %arg0, %c0_i32 : i32, i32
  }
  func.func @transform_1(%arg0: i32) -> (i32, i32) {
    %c0_i32 = arith.constant 0 : i32
    %c0_i32_0 = arith.constant 0 : i32
    %c0_i32_1 = arith.constant 0 : i32
    return %c0_i32, %c0_i32_0 : i32, i32
  }
  func.func @transform_2(%arg0: i32) -> (i32, i32) {
    %c0_i32 = arith.constant 0 : i32
    %c0_i32_0 = arith.constant 0 : i32
    %c0_i32_1 = arith.constant 0 : i32
    return %c0_i32, %c0_i32_0 : i32, i32
  }
  func.func @transform_3(%arg0: i32) -> (i32, i32) {
    %c0_i32 = arith.constant 0 : i32
    %c0_i32_0 = arith.constant 0 : i32
    %c0_i32_1 = arith.constant 0 : i32
    return %c0_i32, %c0_i32_0 : i32, i32
  }
  func.func @transform_4(%arg0: i32) -> (i32, i32) {
    %c0_i32 = arith.constant 0 : i32
    %c0_i32_0 = arith.constant 0 : i32
    %c0_i32_1 = arith.constant 0 : i32
    return %c0_i32, %c0_i32_0 : i32, i32
  }
  func.func @transform_5(%arg0: i32) -> (i32, i32) {
    %c0_i32 = arith.constant 0 : i32
    %c0_i32_0 = arith.constant 0 : i32
    return %c0_i32, %arg0 : i32, i32
  }
  func.func @transform_6(%arg0: i32) -> (i32, i32) {
    %c0_i32 = arith.constant 0 : i32
    %c0_i32_0 = arith.constant 0 : i32
    return %c0_i32, %arg0 : i32, i32
  }
}

</mosaic_0001>

<bundles_post_ra>
// kernel: actor_forward.1
= control target key start
LH: loop header
LB: loop body
LE: loop exit
PB: predicated region body
PF: predicated region fallthrough
CT: control target
= control target key end

     0   :  { %12 = vsyncpa [#allocation3], 0  ;;  %s1429_s0 = inlined_call_operand.vmem [shape: f32[256,32], index: 0, kind: input, shape index: {}]   ;;  %s1430_s1 = inlined_call_operand.vmem [shape: bf16[128,32], index: 1, kind: input, shape index: {}]   ;;  %s1431_s2 = inlined_call_operand.vmem [shape: f32[128,1], index: 2, kind: input, shape index: {}]   ;;  %s1432_s3 = inlined_call_operand.vmem [shape: bf16[16,128], index: 3, kind: input, shape index: {}]   ;;  %s1433_s4 = inlined_call_operand.vmem [shape: f32[16,1], index: 4, kind: input, shape index: {}]   ;;  %s1434_s5 = inlined_call_operand.hbm [shape: f32[16,256], index: 5, kind: output, shape index: {0}]   ;;  %s1435_s6 = inlined_call_operand.hbm [shape: f32[16,256], index: 6, kind: output, shape index: {1}]  }
   0x1   :  { %14 = vsyncpa [#allocation3 + $0x1], 0 }
   0x2   :  { %15 = vsyncpa [#allocation5], 0 }
   0x3   :  { %17 = vsyncpa [#allocation5 + $0x1], 0  ;;  %s1147_s21 = smov 0   ;;  %s1149_s22 = smov 0  }
   0x4   :  { %s1151_s23 = smov 0   ;;  %s1153_s24 = smov 0  }
   0x5 LB: > { %s1168_s25 = sadd.s32 4294967295, %s1102_s24   ;;  %s825_s26 = sadd.s32 4294967294, %s1102_s24   ;;  %s1102_s24 = sphi %s1153_s24, %s1441_s24   ;;  %s1098_s23 = sphi %s1151_s23, %s1440_s23   ;;  %s1094_s22 = sphi %s1149_s22, %s1439_s22   ;;  %s1090_s21 = sphi %s1147_s21, %s1438_s21  }
   0x6   : > { %s1172_s27 = sadd.s32 1, %s1102_s24   ;;  %s140_s28 = sadd.s32 1, %s1098_s23 }
   0x7   : > { %s137_s29 = ssub.s32 %s1102_s24, %s1172_s27  ;;  %p150_p0 = scmp.ne.s32.totalorder %s1098_s23, %s1094_s22 }
   0x8   : > { %p138_p1 = scmp.eq.s32.totalorder %s137_s29, 0  ;;  %p151_p2 = scmp.eq.s32.totalorder %s1168_s25, 1 }
   0x9   : > { %p156_p3 = scmp.ne.s32.totalorder %s1094_s22, %s1090_s21  ;;  %p157_p4 = scmp.eq.s32.totalorder %s825_s26, 1 }
   0xa   : > { %s1183_s30 = scalar_select %p138_p1, %s1098_s23, %s140_s28  }
   0xb   : > { %p1185_p5 = por %p151_p2, %p150_p0  ;;  %p1189_p6 = por %p157_p4, %p156_p3 }
   0xc   : > { %p828_p7 = scmp.ge.s32.totalorder %s1102_s24, 1  ;;  %p222_p8 = scmp.lt.s32.totalorder %s1102_s24, 3 }
   0xe   : > { %p223_p9 = pnand %p828_p7, %p222_p8 }
   0xf   : > { %s831_s9 = sshll.u32 (!%p223_p9), %s1168_s25, 4  ;;  %v993_v0 = vld [vmem:[%s1430_s1] sm:$0xff] (!%p223_p9)   ;;  %vm440_vm0 = vcmask (!%p223_p9), 261120   ;;  %v1104_v1 = vmov (!%p223_p9), 0   ;;  %v306_v12 = vld [vmem:[%s1431_s2 + $0x10] sm:$0xff] (!%p223_p9)  ;;  %v305_v13 = vld [vmem:[%s1431_s2 + $0x8] sm:$0xff] (!%p223_p9) }
  0x10   : > { %226 = sbr.rel (%p223_p9) target bundleno = 643 (0x283), region = 40  ;;  %p258_p10 = scmp.lt.s32.totalorder (!%p223_p9), %s831_s9, 31  ;;  %897 = vmatprep.mubr.msk.bf16.mxu0 (!%p223_p9), %vm440_vm0, %v993_v0  ;;  %991 = vset.pattern.permute.xlu0 (!%p223_p9), %v1104_v1  ;;  %v304_v11 = vld [vmem:[%s1431_s2] sm:$0xff] (!%p223_p9)  ;;  %v307_v16 = vld [vmem:[%s1431_s2 + $0x18] sm:$0xff] (!%p223_p9)  ;;  %v309_v18 = vld [vmem:[%s1431_s2 + $0x28] sm:$0xff] (!%p223_p9)  ;;  %v1105_v59 = vmov (!%p223_p9), 0.0  }
  0x11   : > { %992 = vset.pattern.permute.xlu1 (!%p223_p9), %v1104_v1  ;;  %322 = vperm.xlu0 (!%p223_p9), %991, %v304_v11   ;;  %v308_v17 = vld [vmem:[%s1431_s2 + $0x20] sm:$0xff] (!%p223_p9)  ;;  %v310_v21 = vld [vmem:[%s1431_s2 + $0x30] sm:$0xff] (!%p223_p9)  ;;  %v311_v24 = vld [vmem:[%s1431_s2 + $0x38] sm:$0xff] (!%p223_p9)  ;;  %vm1106_vm1 = vmmov (!%p223_p9), 0   ;;  %s1332_s10 = sand.u32 (!%p223_p9), 1, %s1094_s22   ;;  %s852_s13 = sshll.u32 (!%p223_p9), %s1168_s25, 7 }
  0x12   : > { %332 = vperm.xlu1 (!%p223_p9), %992, %v306_v12   ;;  %v312_v25 = vld [vmem:[%s1431_s2 + $0x40] sm:$0xff] (!%p223_p9)  ;;  %v313_v26 = vld [vmem:[%s1431_s2 + $0x48] sm:$0xff] (!%p223_p9)  ;;  %v314_v29 = vld [vmem:[%s1431_s2 + $0x50] sm:$0xff] (!%p223_p9)  ;;  %913 = vmatprep.subr.bf16.mxu1 (!%p223_p9), %v1105_v59  ;;  %s829_s11 = sshll.u32 (!%p223_p9), %s1332_s10, 4  ;;  %s1345_s17 = scalar_lea.hbm (!%p223_p9), %s1434_s5, %s852_s13 }
  0x13   : > { %v315_v32 = vld [vmem:[%s1431_s2 + $0x58] sm:$0xff] (!%p223_p9)  ;;  %v316_v33 = vld [vmem:[%s1431_s2 + $0x60] sm:$0xff] (!%p223_p9)  ;;  %v317_v34 = vld [vmem:[%s1431_s2 + $0x68] sm:$0xff] (!%p223_p9)  ;;  %929 = vmatprep.mubr.msk.bf16.mxu1 (!%p223_p9), %vm1106_vm1, %v1105_v59  ;;  %s699_s18 = scalar_lea.sflag (!%p223_p9), [#allocation3], %s1332_s10  ;;  %s1107_s20 = smov (!%p223_p9), [#allocation2]  }
  0x14   : > { %v318_v37 = vld [vmem:[%s1431_s2 + $0x70] sm:$0xff] (!%p223_p9)  ;;  %v319_v40 = vld [vmem:[%s1431_s2 + $0x78] sm:$0xff] (!%p223_p9)  ;;  %v612_v41 = vld [vmem:[%s1433_s4] sm:$0xff] (!%p223_p9)  ;;  %s1012_s26 = sshll.u32 (!%p223_p9), %s1107_s20, 4  ;;  %s1013_s26 = int_to_ptr.vmem [resolvable:$false] %s1012_s26 }
  0x15   : > { %327 = vperm.xlu0 (!%p223_p9), %991, %v305_v13   ;;  %v613_v42 = vld [vmem:[%s1433_s4 + $0x8] sm:$0xff] (!%p223_p9)  ;;  %v995_v53 = vld [vmem:[%s1430_s1 + $0x10] sm:$0xff] (!%p223_p9)   ;;  %v996_v54 = vld [vmem:[%s1430_s1 + $0x18] sm:$0xff] (!%p223_p9)   ;;  %s1014_s28 = scalar_lea.vmem (!%p223_p9), %s1013_s26, 512 }
  0x16   : > { %337 = vperm.xlu1 (!%p223_p9), %992, %v307_v16   ;;  %v994_v52 = vld [vmem:[%s1430_s1 + $0x8] sm:$0xff] (!%p223_p9)   ;;  %v997_v55 = vld [vmem:[%s1430_s1 + $0x20] sm:$0xff] (!%p223_p9)   ;;  %v999_v57 = vld [vmem:[%s1430_s1 + $0x30] sm:$0xff] (!%p223_p9)  }
  0x17   : > { %s1443_s9 = smov (!%p258_p10, %s831_s9), 31  ;;  %v998_v56 = vld [vmem:[%s1430_s1 + $0x28] sm:$0xff]   ;;  %v1000_v58 = vld [vmem:[%s1430_s1 + $0x38] sm:$0xff]  }
  0x18   : > { %s832_s12 = sshll.u32 %s1443_s9, 3 }
  0x19   : > { %s1203_s15 = scalar_lea.vmem %s1429_s0, %s832_s12  ;;  %342 = vperm.xlu0 %991, %v308_v17   ;;  %s249_s12 = scalar_lea.vmem [#allocation2], %s829_s11 }
  0x1a   : > { %v264_v2 = vld [vmem:[%s1203_s15] sm:$0xff]  ;;  %v265_v3 = vld [vmem:[%s1203_s15 + $0x8] sm:$0xff]  ;;  %v266_v4 = vld [vmem:[%s1203_s15 + $0x10] sm:$0xff]  ;;  %347 = vperm.xlu1 %992, %v309_v18  }
  0x1b   : > { %v280_v5 = vpack.c.bf16 %v265_v3, %v264_v2  ;;  %v267_v6 = vld [vmem:[%s1203_s15 + $0x18] sm:$0xff]  ;;  %v268_v9 = vld [vmem:[%s1203_s15 + $0x20] sm:$0xff]  ;;  %v269_v10 = vld [vmem:[%s1203_s15 + $0x28] sm:$0xff] }
  0x1c   : > { %v281_v7 = vpack.c.bf16 %v267_v6, %v266_v4  ;;  %v282_v15 = vpack.c.bf16 %v269_v10, %v268_v9  ;;  %v270_v19 = vld [vmem:[%s1203_s15 + $0x30] sm:$0xff]  ;;  %v271_v20 = vld [vmem:[%s1203_s15 + $0x38] sm:$0xff]  ;;  %v272_v27 = vld [vmem:[%s1203_s15 + $0x40] sm:$0xff] }
  0x1d   : > { %933 = vmatprep.subr.msk.bf16.mxu0 %vm440_vm0, %v280_v5  ;;  %v466_v8 = vsel %vm440_vm0, %v280_v5, 0  ;;  %v283_v23 = vpack.c.bf16 %v271_v20, %v270_v19  ;;  %352 = vperm.xlu0 %991, %v310_v21   ;;  %v273_v28 = vld [vmem:[%s1203_s15 + $0x48] sm:$0xff]  ;;  %v274_v35 = vld [vmem:[%s1203_s15 + $0x50] sm:$0xff]  ;;  %v275_v36 = vld [vmem:[%s1203_s15 + $0x58] sm:$0xff] }
  0x1e   : > { %882 = vmatpush3.bf16.xpose.msra.mxu0 %v466_v8  ;;  %v469_v14 = vsel %vm440_vm0, %v281_v7, 0  ;;  %v472_v22 = vsel %vm440_vm0, %v282_v15, 0  ;;  %357 = vperm.xlu1 %992, %v311_v24   ;;  %v284_v31 = vpack.c.bf16 %v273_v28, %v272_v27  ;;  %v285_v39 = vpack.c.bf16 %v275_v36, %v274_v35  ;;  %v276_v43 = vld [vmem:[%s1203_s15 + $0x60] sm:$0xff]  ;;  %v277_v44 = vld [vmem:[%s1203_s15 + $0x68] sm:$0xff]  ;;  %v278_v47 = vld [vmem:[%s1203_s15 + $0x70] sm:$0xff] }
  0x1f   : > { %934 = vmatprep.subr.msk.bf16.mxu0 %vm440_vm0, %v281_v7  ;;  %v475_v30 = vsel %vm440_vm0, %v283_v23, 0  ;;  %v286_v46 = vpack.c.bf16 %v277_v44, %v276_v43  ;;  %v279_v48 = vld [vmem:[%s1203_s15 + $0x78] sm:$0xff]  ;;  %s716_s15 = sshll.u32 %s249_s12, 4  ;;  %s1338_s15 = int_to_ptr.vmem [resolvable:$true] %s716_s15 }
  0x20   : > { %v478_v38 = vsel %vm440_vm0, %v284_v31, 0  ;;  %v481_v45 = vsel %vm440_vm0, %v285_v39, 0  ;;  %v287_v50 = vpack.c.bf16 %v279_v48, %v278_v47  ;;  %s1008_s19 = scalar_lea.vmem %s1338_s15, 256  ;;  %p1015_p0 = scmp.lt.s32.totalorder %s1338_s15, %s1013_s26 }
  0x21   : > { %362 = vperm.xlu0 %991, %v312_v25   ;;  %v484_v49 = vsel %vm440_vm0, %v286_v46, 0  ;;  %p1009_p11 = scmp.ne.s32.totalorder %s1338_s15, %s1008_s19  ;;  %p1016_p1 = scmp.lt.s32.totalorder %s1014_s28, %s1008_s19 }
  0x22   : > { %367 = vperm.xlu1 %992, %v313_v26   ;;  %v487_v51 = vsel %vm440_vm0, %v287_v50, 0 }
  0x23   : > { %p1010_p12 = pnand %p1009_p11, %p1185_p5  ;;  %p1017_p2 = por %p1016_p1, %p1015_p0 }
  0x25   : > { %372 = vperm.xlu0 %991, %v314_v29   ;;  %p1011_p13 = pneg %p1010_p12 }
  0x26   : > { %884 = vmatpush3.bf16.xpose.msra.mxu0 %v469_v14  ;;  %377 = vperm.xlu1 %992, %v315_v32  }
  0x27   : > { %935 = vmatprep.subr.msk.bf16.mxu0 %vm440_vm0, %v282_v15  ;;  %p1018_p3 = pnand %p1017_p2, %p1011_p13 }
  0x29   : > { %382 = vperm.xlu0 %991, %v316_v33  }
  0x2a   : > { %387 = vperm.xlu1 %992, %v317_v34  }
  0x2d   : > { %392 = vperm.xlu0 %991, %v318_v37  }
  0x2e   : > { %886 = vmatpush3.bf16.xpose.msra.mxu0 %v472_v22  ;;  %397 = vperm.xlu1 %992, %v319_v40  }
  0x2f   : > { %936 = vmatprep.subr.msk.bf16.mxu0 %vm440_vm0, %v283_v23 }
  0x31   : > { %616 = vperm.xlu0 %991, %v612_v41  }
  0x32   : > { %621 = vperm.xlu1 %992, %v613_v42  }
  0x36   : > { %888 = vmatpush3.bf16.xpose.msra.mxu0 %v475_v30 }
  0x37   : > { %937 = vmatprep.subr.msk.bf16.mxu0 %vm440_vm0, %v284_v31 }
  0x3e   : > { %890 = vmatpush3.bf16.xpose.msra.mxu0 %v478_v38 }
  0x3f   : > { %938 = vmatprep.subr.msk.bf16.mxu0 %vm440_vm0, %v285_v39 }
  0x46   : > { %892 = vmatpush3.bf16.xpose.msra.mxu0 %v481_v45 }
  0x47   : > { %939 = vmatprep.subr.msk.bf16.mxu0 %vm440_vm0, %v286_v46 }
  0x4e   : > { %894 = vmatpush3.bf16.xpose.msra.mxu0 %v484_v49 }
  0x4f   : > { %940 = vmatprep.subr.msk.bf16.mxu0 %vm440_vm0, %v287_v50 }
  0x56   : > { %896 = vmatpush3.bf16.xpose.msra.mxu0 %v487_v51 }
  0x5d   : > { %898 = vmatmul.mubr.msk.bf16.vlgmr.msra.gmra.mrb[0].mxu0 %vm440_vm0, %v994_v52 }
  0x5e   : > { %901 = vmatprep.mubr.msk.bf16.mxu0 %vm440_vm0, %v995_v53 }
  0x65   : > { %902 = vmatmul.mubr.msk.bf16.gmra.mrb[4].mxu0 %vm440_vm0, %v996_v54 }
  0x66   : > { %905 = vmatprep.mubr.msk.bf16.mxu0 %vm440_vm0, %v997_v55 }
  0x6d   : > { %906 = vmatmul.mubr.msk.bf16.gmra.mrb[8].mxu0 %vm440_vm0, %v998_v56 }
  0x6e   : > { %909 = vmatprep.mubr.msk.bf16.mxu0 %vm440_vm0, %v999_v57 }
  0x75   : > { %910 = vmatmul.mubr.msk.bf16.gmra.mrb[12].mxu0 %vm440_vm0, %v1000_v58 }
  0x90   : > { %v323_v60 = vpop.permute.xlu0 %322 }
  0x91   : > { %v333_v61 = vpop.permute.xlu1 %332 }
  0x94   : > { %v328_v62 = vpop.permute.xlu0 %327 }
  0x95   : > { %v338_v63 = vpop.permute.xlu1 %337 }
  0x98   : > { %v343_v0 = vpop.permute.xlu0 %342 }
  0x99   : > { %v348_v1 = vpop.permute.xlu1 %347 }
  0x9c   : > { %v353_v2 = vpop.permute.xlu0 %352 }
  0x9d   : > { %v358_v6 = vpop.permute.xlu1 %357 }
  0xa0   : > { %v363_v14 = vpop.permute.xlu0 %362 }
  0xa1   : > { %v368_v18 = vpop.permute.xlu1 %367 }
  0xa4   : > { %v373_v27 = vpop.permute.xlu0 %372 }
  0xa5   : > { %v378_v31 = vpop.permute.xlu1 %377 }
  0xa8   : > { %v383_v39 = vpop.permute.xlu0 %382 }
  0xa9   : > { %v388_v44 = vpop.permute.xlu1 %387 }
  0xac   : > { %v393_v51 = vpop.permute.xlu0 %392 }
  0xad   : > { %v398_v56 = vpop.permute.xlu1 %397 }
 0x130   : > { %v899_v3 = vpop.f32.mrb[0].mxu0 }
 0x131   : > { %v532_v4 = vadd.f32 %v899_v3, %v333_v61  ;;  %v523_v5 = vpop.f32.mrb[1].mxu0 }
 0x132   : > { %v524_v7 = vadd.f32 %v523_v5, %v323_v60  ;;  %v900_v8 = vpop.f32.mrb[2].mxu0  ;;  %v1001_v5 = vld [vmem:[%s1432_s3] sm:$0xff]  }
 0x133   : > { %v535_v9 = vadd.f32 %v900_v8, %v338_v63  ;;  %v526_v10 = vpop.f32.mrb[3].mxu0  ;;  %v588_v12 = vmax.f32 %v532_v4, 0.0 }
 0x134   : > { %v527_v11 = vadd.f32 %v526_v10, %v328_v62  ;;  %v586_v15 = vmax.f32 %v524_v7, 0.0 }
 0x135   : > { %v589_v13 = vmax.f32 %v535_v9, 0.0  ;;  %v622_v9 = vpop.permute.xlu1 %621 }
 0x136   : > { %v587_v16 = vmax.f32 %v527_v11, 0.0 }
 0x137   : > { %v603_v17 = vpack.c.bf16 %v589_v13, %v588_v12 }
 0x138   : > { %v903_v19 = vpop.f32.mrb[4].mxu0  ;;  %v602_v20 = vpack.c.bf16 %v587_v16, %v586_v15 }
 0x139   : > { %v548_v21 = vadd.f32 %v903_v19, %v353_v2  ;;  %v539_v22 = vpop.f32.mrb[5].mxu0 }
 0x13a   : > { %v540_v23 = vadd.f32 %v539_v22, %v343_v0  ;;  %v904_v24 = vpop.f32.mrb[6].mxu0  ;;  %914 = vmatpush3.bf16.msra.mxu1 %v602_v20 }
 0x13b   : > { %v551_v25 = vadd.f32 %v904_v24, %v358_v6  ;;  %v542_v26 = vpop.f32.mrb[7].mxu0  ;;  %915 = vmatprep.subr.bf16.mxu1 %v1105_v59  ;;  %v592_v29 = vmax.f32 %v548_v21, 0.0  ;;  %v617_v6 = vpop.permute.xlu0 %616 }
 0x13c   : > { %v543_v28 = vadd.f32 %v542_v26, %v348_v1  ;;  %v590_v32 = vmax.f32 %v540_v23, 0.0 }
 0x13d   : > { %v593_v30 = vmax.f32 %v551_v25, 0.0 }
 0x13e   : > { %v591_v33 = vmax.f32 %v543_v28, 0.0  ;;  %916 = vmatpush3.bf16.msra.mxu1 %v603_v17 }
 0x13f   : > { %v605_v34 = vpack.c.bf16 %v593_v30, %v592_v29  ;;  %917 = vmatprep.subr.bf16.mxu1 %v1105_v59 }
 0x140   : > { %v604_v35 = vpack.c.bf16 %v591_v33, %v590_v32  ;;  %v907_v36 = vpop.f32.mrb[8].mxu0 }
 0x141   : > { %v564_v37 = vadd.f32 %v907_v36, %v373_v27  ;;  %v555_v38 = vpop.f32.mrb[9].mxu0 }
 0x142   : > { %v556_v40 = vadd.f32 %v555_v38, %v363_v14  ;;  %v908_v41 = vpop.f32.mrb[10].mxu0  ;;  %918 = vmatpush3.bf16.msra.mxu1 %v604_v35 }
 0x143   : > { %v567_v42 = vadd.f32 %v908_v41, %v378_v31  ;;  %v558_v43 = vpop.f32.mrb[11].mxu0  ;;  %919 = vmatprep.subr.bf16.mxu1 %v1105_v59  ;;  %v596_v46 = vmax.f32 %v564_v37, 0.0 }
 0x144   : > { %v559_v45 = vadd.f32 %v558_v43, %v368_v18  ;;  %v594_v48 = vmax.f32 %v556_v40, 0.0 }
 0x145   : > { %v597_v47 = vmax.f32 %v567_v42, 0.0 }
 0x146   : > { %v595_v49 = vmax.f32 %v559_v45, 0.0  ;;  %920 = vmatpush3.bf16.msra.mxu1 %v605_v34 }
 0x147   : > { %v607_v50 = vpack.c.bf16 %v597_v47, %v596_v46  ;;  %921 = vmatprep.subr.bf16.mxu1 %v1105_v59 }
 0x148   : > { %v606_v52 = vpack.c.bf16 %v595_v49, %v594_v48  ;;  %v911_v53 = vpop.f32.mrb[12].mxu0 }
 0x149   : > { %v580_v54 = vadd.f32 %v911_v53, %v393_v51  ;;  %v571_v55 = vpop.f32.mrb[13].mxu0 }
 0x14a   : > { %v572_v57 = vadd.f32 %v571_v55, %v383_v39  ;;  %v912_v58 = vpop.f32.mrb[14].mxu0  ;;  %922 = vmatpush3.bf16.msra.mxu1 %v606_v52 }
 0x14b   : > { %v583_v60 = vadd.f32 %v912_v58, %v398_v56  ;;  %v574_v61 = vpop.f32.mrb[15].mxu0  ;;  %923 = vmatprep.subr.bf16.mxu1 %v1105_v59  ;;  %v600_v63 = vmax.f32 %v580_v54, 0.0 }
 0x14c   : > { %v575_v62 = vadd.f32 %v574_v61, %v388_v44  ;;  %v598_v1 = vmax.f32 %v572_v57, 0.0 }
 0x14d   : > { %v601_v0 = vmax.f32 %v583_v60, 0.0 }
 0x14e   : > { %v599_v2 = vmax.f32 %v575_v62, 0.0  ;;  %924 = vmatpush3.bf16.msra.mxu1 %v607_v50 }
 0x14f   : > { %v609_v3 = vpack.c.bf16 %v601_v0, %v600_v63  ;;  %925 = vmatprep.subr.bf16.mxu1 %v1105_v59 }
 0x150   : > { %v608_v4 = vpack.c.bf16 %v599_v2, %v598_v1 }
 0x152   : > { %926 = vmatpush3.bf16.msra.mxu1 %v608_v4 }
 0x153   : > { %927 = vmatprep.subr.bf16.mxu1 %v1105_v59 }
 0x156   : > { %928 = vmatpush3.bf16.msra.mxu1 %v609_v3 }
 0x159   : > { %930 = vmatmul.mubr.bf16.vlgmr.msra.gmra.mrb[0].mxu1 %v1001_v5 }
 0x22c   : > { %v664_v59 = vpop.f32.mrb[0].mxu1 }
 0x22d   : > { %v665_v7 = vadd.f32 %v664_v59, %v617_v6  ;;  %v931_v8 = vpop.f32.mrb[1].mxu1 }
 0x22e   : > { %v667_v10 = vpop.f32.mrb[2].mxu1 }
 0x22f   : > { %671 = vst [vmem:[%s249_s12] sm:$0xff] %v665_v7  ;;  %v668_v11 = vadd.f32 %v667_v10, %v622_v9  ;;  %v932_v12 = vpop.f32.mrb[3].mxu1 }
 0x231   : > { %672 = vst [vmem:[%s249_s12 + $0x8] sm:$0xff] %v668_v11  ;;  %v673_v13 = vmax.f32 %v665_v7, %v668_v11 }
 0x232   : > { %1021 = shalt.err (!%p1018_p3)
}
 0x233   : > { %s1022_s29 = scalar_lea.hbm %s1345_s17, 256  ;;  %s1026_s14 = scalar_lea.hbm %s1434_s5, 512 }
 0x234   : > { %p1023_p4 = scmp.ne.s32.totalorder %s1345_s17, %s1022_s29  ;;  %p1027_p9 = scmp.lt.u32.totalorder %s1345_s17, %s1434_s5 }
 0x235   : > { %p1028_p10 = scmp.lt.u32.totalorder %s1026_s14, %s1022_s29  ;;  %p1030_p12 = scmp.lt.u32.totalorder %s1022_s29, %s1345_s17 }
 0x236   : > { %p1024_p7 = pnand %p1023_p4, %p1185_p5 }
 0x237   : > { %p1029_p11 = por %p1028_p10, %p1027_p9 }
 0x238   : > { %p1025_p8 = pneg %p1024_p7 }
 0x239   : > { %p1031_p13 = por %p1030_p12, %p1029_p11 }
 0x23b   : > { %p1032_p0 = pnand %p1031_p13, %p1025_p8 }
 0x23d   : > { %1035 = shalt.err (!%p1032_p0)
}
 0x23e   : > { %s1108_s19 = smov 128   ;;  %s1109_s26 = smov 256   ;;  %v674_v14 = vrot.slane %v673_v13, 4 }
 0x23f   : > { %s1110_s28 = smov 8   ;;  %s1383_s9 = scalar_lea.hbm %s1435_s6, %s852_s13 }
 0x240   : > { %941 = dma.vmem_to_hbm [thread:$0]  (%p1185_p5), %s1338_s15, 256, %s1345_s17, %s699_s18, %s1108_s19, %s1109_s26, %s1110_s28   ;;  %v675_v15 = vmax.f32 %v673_v13, %v674_v14 }
 0x241   : > { %s256_s15 = scalar_lea.vmem [#allocation4], %s829_s11  ;;  %s704_s12 = scalar_lea.sflag [#allocation5], %s1332_s10 }
 0x242   : > { %v676_v16 = vrot.slane %v675_v15, 2  ;;  %s731_s17 = sshll.u32 %s256_s15, 4  ;;  %s1111_s11 = smov [#allocation4]   ;;  %s1376_s17 = int_to_ptr.vmem [resolvable:$true] %s731_s17 }
 0x243   : > { %s1036_s14 = scalar_lea.vmem %s1376_s17, 256  ;;  %s1040_s16 = sshll.u32 %s1111_s11, 4  ;;  %s1041_s16 = int_to_ptr.vmem [resolvable:$false] %s1040_s16 }
 0x244   : > { %v677_v17 = vmax.f32 %v675_v15, %v676_v16  ;;  %p1037_p1 = scmp.ne.s32.totalorder %s1376_s17, %s1036_s14  ;;  %s1042_s20 = scalar_lea.vmem %s1041_s16, 512 }
 0x245   : > { %p1043_p4 = scmp.lt.s32.totalorder %s1376_s17, %s1041_s16  ;;  %p1044_p7 = scmp.lt.s32.totalorder %s1042_s20, %s1036_s14 }
 0x246   : > { %v678_v18 = vrot.slane %v677_v17, 1  ;;  %p1038_p2 = pnand %p1037_p1, %p1185_p5 }
 0x247   : > { %p1045_p8 = por %p1044_p7, %p1043_p4 }
 0x248   : > { %v679_v19 = vmax.f32 %v677_v17, %v678_v18  ;;  %p1039_p3 = pneg %p1038_p2 }
 0x24a   : > { %v680_v20 = vsub.f32 %v665_v7, %v679_v19  ;;  %v681_v21 = vsub.f32 %v668_v11, %v679_v19  ;;  %p1046_p9 = pnand %p1045_p8, %p1039_p3 }
 0x24c   : > { %v682_v22 = vmul.f32 1.442695, %v680_v20  ;;  %v684_v23 = vmul.f32 1.442695, %v681_v21 }
 0x24e   : > { %1002 = vpow2.f32 %v682_v22 }
 0x24f   : > { %1004 = vpow2.f32 %v684_v23 }
 0x258   : > { %v1003_v24 = vpop.eup %1002 }
 0x259   : > { %v1005_v25 = vpop.eup %1004 }
 0x25a   : > { %v686_v26 = vadd.f32 %v1005_v25, %v1003_v24 }
 0x25c   : > { %v687_v27 = vrot.slane %v686_v26, 4 }
 0x25e   : > { %v688_v28 = vadd.f32 %v687_v27, %v686_v26 }
 0x260   : > { %v689_v29 = vrot.slane %v688_v28, 2 }
 0x262   : > { %v690_v30 = vadd.f32 %v689_v29, %v688_v28 }
 0x264   : > { %v691_v31 = vrot.slane %v690_v30, 1 }
 0x266   : > { %v692_v32 = vadd.f32 %v691_v31, %v690_v30 }
 0x268   : > { %1006 = vrcp.f32 %v692_v32 }
 0x272   : > { %v1007_v33 = vpop.eup %1006 }
 0x273   : > { %v695_v34 = vmul.f32 %v1007_v33, %v1005_v25  ;;  %v694_v35 = vmul.f32 %v1007_v33, %v1003_v24 }
 0x275   : > { %697 = vst [vmem:[%s256_s15 + $0x8] sm:$0xff] %v695_v34  ;;  %696 = vst [vmem:[%s256_s15] sm:$0xff] %v694_v35 }
 0x276   : > { %1049 = shalt.err (!%p1046_p9)
}
 0x277   : > { %s1050_s25 = scalar_lea.hbm %s1383_s9, 256  ;;  %s1054_s18 = scalar_lea.hbm %s1435_s6, 512 }
 0x278   : > { %p1051_p10 = scmp.ne.s32.totalorder %s1383_s9, %s1050_s25  ;;  %p1055_p13 = scmp.lt.u32.totalorder %s1383_s9, %s1435_s6 }
 0x279   : > { %p1056_p0 = scmp.lt.u32.totalorder %s1054_s18, %s1050_s25  ;;  %p1058_p2 = scmp.lt.u32.totalorder %s1050_s25, %s1383_s9 }
 0x27a   : > { %p1052_p11 = pnand %p1051_p10, %p1185_p5 }
 0x27b   : > { %p1057_p1 = por %p1056_p0, %p1055_p13 }
 0x27c   : > { %p1053_p12 = pneg %p1052_p11 }
 0x27d   : > { %p1059_p3 = por %p1058_p2, %p1057_p1 }
 0x27f   : > { %p1060_p4 = pnand %p1059_p3, %p1053_p12 }
 0x281   : > { %1063 = shalt.err (!%p1060_p4)
}
 0x282   : > { %942 = dma.vmem_to_hbm [thread:$0]  (%p1185_p5), %s1376_s17, 256, %s1383_s9, %s704_s12, %s1108_s19, %s1109_s26, %s1110_s28  }
 0x283 PF: > { %p952_p7 = scmp.ge.s32.totalorder %s1102_s24, 2  ;;  %s746_s14 = sand.u32 1, %s1090_s21  }
 0x284   : > { %s747_s16 = scalar_lea.sflag [#allocation3], %s746_s14 }
 0x285   : > { %p946_p8 = pnand %p952_p7, %p1189_p6 }
 0x287   : > { %1081 = dma.done.wait (!%p946_p8), %s747_s16, 256  }
 0x288   : > { %1083 = vsyncadd (!%p946_p8), %s747_s16, 4294967040  ;;  %s756_s7 = scalar_lea.sflag [#allocation5], %s746_s14 }
 0x289   : > { %1085 = dma.done.wait (!%p946_p8), %s756_s7, 256  }
 0x28a   : > { %1087 = vsyncadd (!%p946_p8), %s756_s7, 4294967040  ;;  %p20_p5 = scmp.ge.s32.totalorder %s1172_s27, 4   ;;  %s1438_s21 = smov %s1094_s22 }
 0x28b   : > { %s1439_s22 = smov %s1098_s23  ;;  %s1440_s23 = smov %s1183_s30 }
 0x28c   : > { %s1441_s24 = smov %s1172_s27  ;;  %22 = sbr.rel (!%p20_p5) target bundleno = 5 (0x5), region = 92 }
 0x293   :  { %761 = vsyncpa [#allocation3], 1 }
 0x294   :  { %763 = vsyncpa [#allocation3 + $0x1], 1 }
 0x295   :  { %764 = vsyncpa [#allocation5], 1 }
 0x296   :  { %766 = vsyncpa [#allocation5 + $0x1], 1 }

</bundles_post_ra>
